<compile_context>
chip_gen: v6e
topology: v6e:2x2x1
jax: 0.10.0
libtpu: 0.0.40
codegen_flags: <defaults>
</compile_context>

<pallas_src>
import math

import jax
import jax.numpy as jnp
from jax.experimental import pallas as pl
from jax.experimental.pallas import tpu as pltpu


def _triple(v):
    if isinstance(v, (tuple, list)):
        return tuple(v)
    return (v, v, v)


def _out_dim(size, k, s, p, d):
    return (size + 2 * p - (d * (k - 1) + 1)) // s + 1


def _round_up(a, b):
    return (a + b - 1) // b * b


# ---------------------------------------------------------------------------
# Pallas kernel: grouped im2col matmul + bias, CK-tiled with f32 accumulator.
#   cols_ref : (1, 1, tk, Pt)    deform-im2col columns for (batch i, group j, CK tile k)
#   w_ref    : (1, opg, tk)      per-group flattened conv weight tile
#   b_ref    : (1, opg, 1)       per-group bias (f32)
#   o_ref    : (1, 1, opg, Pt)   f32 output tile (exact P, ragged last block)
#   acc_ref  : (opg, Pt)         f32 VMEM accumulator scratch
# ---------------------------------------------------------------------------
def _grouped_matmul_bias_kernel(cols_ref, w_ref, b_ref, o_ref, acc_ref):
    k = pl.program_id(3)

    @pl.when(k == 0)
    def _():
        acc_ref[...] = jnp.zeros_like(acc_ref)

    acc_ref[...] += jnp.dot(w_ref[0], cols_ref[0, 0],
                            preferred_element_type=jnp.float32)

    @pl.when(k == pl.num_programs(3) - 1)
    def _():
        o_ref[0, 0] = (acc_ref[...] + b_ref[0]).astype(o_ref.dtype)


def _pick_tiles(p):
    """Lane tile (P) and contraction-tile cap, sized per TPU generation."""
    try:
        big_vmem = pltpu.get_tpu_info().vmem_capacity_bytes >= (100 << 20)
    except Exception:  # conservative default if the query is unavailable
        big_vmem = False
    p_tile = 1024 if big_vmem else 512      # v5e/v6e: 128 MiB VMEM; v7x: 64 MiB
    p_tile = min(p_tile, _round_up(p, 128))
    tk_max = 2048 if big_vmem else 1024     # CK tile cap (multiple of 128)
    return p_tile, tk_max


def _grouped_matmul_bias(cols, w, b, *, p_tile, tk):
    # cols : (N, G, CKp, P)  bf16/f32 ; w : (G, opg_pad, CKp) ; b : (G, opg_pad, 1) f32
    n, g, ckp, p = cols.shape
    opg = w.shape[1]
    n_pt = pl.cdiv(p, p_tile)
    n_kt = ckp // tk

    # Per-step VMEM: double-buffered streaming operands + f32 accumulator scratch.
    need = (2 * tk * p_tile * cols.dtype.itemsize    # cols, 2 pipeline buffers
            + 2 * opg * tk * w.dtype.itemsize        # weight, 2 buffers
            + 2 * opg * p_tile * 4                   # f32 output, 2 buffers
            + opg * p_tile * 4                       # accumulator scratch
            + 2 * opg * 4)                           # bias
    # Cap v7x-safe (64 MiB physical VMEM) but never below the actual requirement.
    vmem_limit = int(max(16 << 20, min(2 * need, 32 << 20), need + (2 << 20)))

    return pl.pallas_call(
        _grouped_matmul_bias_kernel,
        out_shape=jax.ShapeDtypeStruct((n, g, opg, p), jnp.float32),
        grid_spec=pltpu.PrefetchScalarGridSpec(
            num_scalar_prefetch=0,
            grid=(n, g, n_pt, n_kt),
            in_specs=[
                pl.BlockSpec((1, 1, tk, p_tile), lambda i, j, q, k: (i, j, k, q)),
                pl.BlockSpec((1, opg, tk), lambda i, j, q, k: (j, 0, k)),
                pl.BlockSpec((1, opg, 1), lambda i, j, q, k: (j, 0, 0)),
            ],
            out_specs=pl.BlockSpec((1, 1, opg, p_tile),
                                   lambda i, j, q, k: (i, j, 0, q)),
            scratch_shapes=[pltpu.VMEM((opg, p_tile), jnp.float32)],
        ),
        compiler_params=pltpu.CompilerParams(
            dimension_semantics=("parallel", "parallel", "parallel", "arbitrary"),
            vmem_limit_bytes=vmem_limit),
    )(cols, w, b)


# ---------------------------------------------------------------------------
# JAX glue: deformable im2col. The 8 trilinear corners are gathered with a single
# batched gather per (n, dg) (index has NO channel dimension) and combined +
# bf16-cast in one fused expression, so `cols` hits HBM exactly once.
# TODO(synk): the data-dependent per-voxel gather stays in XLA (batched jnp.take);
#             arbitrary lane gathers are not expressible with BlockSpec index_maps
#             or Mosaic vector gathers. For very large D*H*W, chunk over P to bound
#             the transient (cpd, 8, K, Pc) intermediate.
# ---------------------------------------------------------------------------
def _deform_im2col(x, offset, kernel_size, stride, padding, dilation,
                   deformable_groups, compute_dtype):
    n, c, d, h, w = x.shape
    kd, kh, kw = kernel_size
    sd, sh, sw = stride
    pd, ph, pw = padding
    dd, dh_, dw_ = dilation
    k_tot = kd * kh * kw
    dg = deformable_groups
    cpd = c // dg

    do = _out_dim(d, kd, sd, pd, dd)
    ho = _out_dim(h, kh, sh, ph, dh_)
    wo = _out_dim(w, kw, sw, pw, dw_)
    p = do * ho * wo

    # kernel tap coordinates (K,)
    kz, ky, kx = jnp.meshgrid(jnp.arange(kd), jnp.arange(kh), jnp.arange(kw), indexing="ij")
    kz = kz.reshape(-1).astype(jnp.float32)
    ky = ky.reshape(-1).astype(jnp.float32)
    kx = kx.reshape(-1).astype(jnp.float32)

    # output voxel coordinates (P,)
    oz, oy, ox = jnp.meshgrid(jnp.arange(do), jnp.arange(ho), jnp.arange(wo), indexing="ij")
    oz = oz.reshape(-1).astype(jnp.float32)
    oy = oy.reshape(-1).astype(jnp.float32)
    ox = ox.reshape(-1).astype(jnp.float32)

    base_z = oz[None, :] * sd - pd + kz[:, None] * dd      # (K, P)
    base_y = oy[None, :] * sh - ph + ky[:, None] * dh_
    base_x = ox[None, :] * sw - pw + kx[:, None] * dw_

    # TODO(synk): offset channel layout assumed (dg, K, 3[d,h,w]); verify against the
    #             specific CUDA deform_conv3d port — the zero-offset check can't catch this.
    off = offset.reshape(n, dg, k_tot, 3, p).astype(jnp.float32)
    pos_z = base_z[None, None] + off[:, :, :, 0]           # (N, dg, K, P)
    pos_y = base_y[None, None] + off[:, :, :, 1]
    pos_x = base_x[None, None] + off[:, :, :, 2]

    z0 = jnp.floor(pos_z)
    y0 = jnp.floor(pos_y)
    x0 = jnp.floor(pos_x)
    lz = pos_z - z0
    ly = pos_y - y0
    lx = pos_x - x0

    # 8 trilinear corners: flat gather index + weight, no channel dimension.
    idx_list, wgt_list = [], []
    for iz in (0, 1):
        zz = z0 + iz
        wz = (1.0 - lz) if iz == 0 else lz
        vz = (zz >= 0) & (zz <= d - 1)
        zi = jnp.clip(zz, 0, d - 1).astype(jnp.int32)
        for iy in (0, 1):
            yy = y0 + iy
            wy = (1.0 - ly) if iy == 0 else ly
            vy = (yy >= 0) & (yy <= h - 1)
            yi = jnp.clip(yy, 0, h - 1).astype(jnp.int32)
            for ix in (0, 1):
                xx = x0 + ix
                wx = (1.0 - lx) if ix == 0 else lx
                vx = (xx >= 0) & (xx <= w - 1)
                xi = jnp.clip(xx, 0, w - 1).astype(jnp.int32)

                wgt_list.append(wz * wy * wx * (vz & vy & vx).astype(jnp.float32))
                idx_list.append((zi * h + yi) * w + xi)

    idx8 = jnp.stack(idx_list, axis=2)          # (N, dg, 8, K, P) int32
    wgt8 = jnp.stack(wgt_list, axis=2)          # (N, dg, 8, K, P) f32

    dhw = d * h * w
    x_g = x.reshape(n, dg, cpd, dhw).astype(jnp.float32)

    def _gather_combine(x_slab, idx_c, wgt_c):
        # x_slab: (cpd, DHW) ; idx_c / wgt_c: (8, K, P)
        vals = jnp.take(x_slab, idx_c.reshape(-1), axis=1, mode="clip")
        vals = vals.reshape(cpd, 8, k_tot, p)
        return jnp.sum(vals * wgt_c[None], axis=1).astype(compute_dtype)

    cols = jax.vmap(jax.vmap(_gather_combine))(x_g, idx8, wgt8)   # (N, dg, cpd, K, P)
    return cols, (do, ho, wo)


def deform_conv3d(x, offset, weight, bias, stride, padding, dilation, groups,
                  deformable_groups, *, compute_dtype=jnp.bfloat16):
    n, c_in = x.shape[:2]
    c_out = weight.shape[0]
    kd, kh, kw = weight.shape[2:]
    k_tot = kd * kh * kw
    cpg = c_in // groups
    opg = c_out // groups
    ck = cpg * k_tot

    cols, (do, ho, wo) = _deform_im2col(
        x, offset, (kd, kh, kw), stride, padding, dilation,
        deformable_groups, compute_dtype)
    p = do * ho * wo

    # Fold conv groups into the kernel grid: (N, G, CK, P) — pure reshapes, no copy.
    cols = cols.reshape(n, groups, ck, p)

    p_tile, tk_max = _pick_tiles(p)

    # Contraction tiling: small CK -> one full-extent block (no pad: block == array
    # dim satisfies the (8,128) rule); large CK -> 128-aligned tiles + zero pad so the
    # f32 accumulator never sees garbage.
    if ck <= tk_max:
        tk, ckp = ck, ck
    else:
        n_kt = -(-ck // tk_max)
        tk = _round_up(-(-ck // n_kt), 128)
        ckp = tk * n_kt
    if ckp != ck:
        cols = jnp.pad(cols, ((0, 0), (0, 0), (0, ckp - ck), (0, 0)))

    # opg padded to a sublane-friendly multiple of 8 (unmasked output stores / clean
    # weight loads); stripped after the kernel only when padding was actually added.
    opg_pad = _round_up(opg, 8)
    w_mat = weight.reshape(groups, opg, ck).astype(compute_dtype)
    w_mat = jnp.pad(w_mat, ((0, 0), (0, opg_pad - opg), (0, ckp - ck)))
    b_mat = jnp.pad(bias.reshape(groups, opg, 1).astype(jnp.float32),
                    ((0, 0), (0, opg_pad - opg), (0, 0)))

    out = _grouped_matmul_bias(cols, w_mat, b_mat, p_tile=p_tile, tk=tk)  # (N,G,opg_pad,P)
    if opg_pad != opg:
        out = out[:, :, :opg, :]
    return out.reshape(n, c_out, do, ho, wo)


# ---------------------------------------------------------------------------
# conv_offset is a plain Conv3d: use XLA's conv directly.
# ---------------------------------------------------------------------------
def _conv3d(x, w, b, stride, padding, groups=1):
    out = jax.lax.conv_general_dilated(
        x, w, window_strides=stride,
        padding=[(q, q) for q in padding],
        dimension_numbers=("NCDHW", "OIDHW", "NCDHW"),
        feature_group_count=groups)
    return out + b.reshape(1, -1, 1, 1, 1)


# ---------------------------------------------------------------------------
# DeformConv3dPack forward:
#   1) offset = conv_offset(x)
#   2) offset = offset * dim_mask
#   3) out    = deform_conv3d(x, offset, weight, bias, ...)
# ---------------------------------------------------------------------------
def deform_conv3d_pack_forward(x, params, cfg):
    ks = cfg["kernel_size"]
    stride = cfg["stride"]
    padding = cfg["padding"]
    dilation = cfg["dilation"]
    groups = cfg["groups"]
    dg = cfg["deformable_groups"]
    k_tot = ks[0] * ks[1] * ks[2]

    offset = _conv3d(x, params["w_off"], params["b_off"], stride, padding)

    dim_mask = jnp.tile(jnp.asarray(cfg["dim_mask"], jnp.float32), dg * k_tot)
    offset = offset * dim_mask.reshape(1, 3 * dg * k_tot, 1, 1, 1)

    return deform_conv3d(x, offset, params["weight"], params["bias"],
                         stride, padding, dilation, groups, dg)


if __name__ == "__main__":
    # small deterministic config: batch=2, Cin=4, Cout=8, spatial=8^3, 3x3x3 kernel
    in_ch, out_ch = 4, 8
    ks = _triple(3)
    cfg = dict(kernel_size=ks, stride=_triple(1), padding=_triple(1),
               dilation=_triple(1), groups=1, deformable_groups=1,
               dim_mask=(1, 1, 1))
    k_tot = ks[0] * ks[1] * ks[2]

    key = jax.random.PRNGKey(0)
    k1, k2, k3, k4, k5 = jax.random.split(key, 5)

    fan_in = (in_ch // cfg["groups"]) * k_tot
    bound_w = 1.0 / math.sqrt(fan_in)           # kaiming_uniform(a=sqrt(5)) bound
    weight = jax.random.uniform(k1, (out_ch, in_ch // cfg["groups"], *ks),
                                jnp.float32, -bound_w, bound_w)
    bias = jax.random.uniform(k2, (out_ch,), jnp.float32, -bound_w, bound_w)

    off_out = cfg["deformable_groups"] * 3 * k_tot
    # NOTE: DeformConv3dPack.init_offset() zero-inits conv_offset; small nonzero values
    # are used here (synthetic init) so the trilinear deformable sampling path is exercised.
    w_off = 0.05 * jax.random.normal(k3, (off_out, in_ch, *ks), jnp.float32)
    b_off = 0.05 * jax.random.normal(k4, (off_out,), jnp.float32)

    params = dict(weight=weight, bias=bias, w_off=w_off, b_off=b_off)

    x = jax.random.normal(k5, (2, in_ch, 8, 8, 8), jnp.float32)

    # sanity 1 (f32 path): zero-offset deformable conv == plain conv3d
    zero_off = jnp.zeros((2, 3 * k_tot, 8, 8, 8), jnp.float32)
    ref = _conv3d(x, w_off, b_off, cfg["stride"], cfg["padding"])
    ours_f32 = deform_conv3d(x, zero_off, w_off, b_off, cfg["stride"], cfg["padding"],
                             (1, 1, 1), 1, 1, compute_dtype=jnp.float32)
    err = float(jnp.max(jnp.abs(ours_f32 - ref)))
    assert err < 1e-3, f"zero-offset conv mismatch (f32 path): {err}"

    # sanity 2 (bf16 hot path): same comparison with a bf16-appropriate tolerance
    ours_bf16 = deform_conv3d(x, zero_off, w_off, b_off, cfg["stride"], cfg["padding"],
                              (1, 1, 1), 1, 1, compute_dtype=jnp.bfloat16)
    err = float(jnp.max(jnp.abs(ours_bf16 - ref)))
    assert err < 5e-2, f"zero-offset conv mismatch (bf16 path): {err}"

    # sanity 3 (grouped path, zero offset): groups=2, deformable_groups=2
    wg = 0.1 * jax.random.normal(k1, (out_ch, in_ch // 2, *ks), jnp.float32)
    bg = 0.1 * jax.random.normal(k2, (out_ch,), jnp.float32)
    zero_off2 = jnp.zeros((2, 3 * 2 * k_tot, 8, 8, 8), jnp.float32)
    ref_g = _conv3d(x, wg, bg, cfg["stride"], cfg["padding"], groups=2)
    ours_g = deform_conv3d(x, zero_off2, wg, bg, cfg["stride"], cfg["padding"],
                           (1, 1, 1), 2, 2, compute_dtype=jnp.float32)
    err = float(jnp.max(jnp.abs(ours_g - ref_g)))
    assert err < 1e-3, f"grouped zero-offset conv mismatch: {err}"

    # full forward (nonzero offsets through conv_offset + dim_mask)
    fwd = jax.jit(lambda xx: deform_conv3d_pack_forward(xx, params, cfg))
    out = fwd(x)
    jax.block_until_ready(out)
    assert out.shape == (2, out_ch, 8, 8, 8), out.shape
    print("KERNEL_OK")
</pallas_src>

<mosaic_0001>
module attributes {stable_mosaic.version = 11 : i64} {
  func.func @_grouped_matmul_bias_kernel(%arg0: i32, %arg1: i32, %arg2: i32, %arg3: i32, %arg4: memref<1x1x108x512xf32, #tpu.memory_space<vmem>>, %arg5: memref<1x88x108xf32, #tpu.memory_space<vmem>>, %arg6: memref<1x88x1xf32, #tpu.memory_space<vmem>>, %arg7: memref<1x1x88x512xf32, #tpu.memory_space<vmem>>, %arg8: memref<88x512xf32, #tpu.memory_space<vmem>>) attributes {dimension_semantics = [#tpu.dimension_semantics<parallel>, #tpu.dimension_semantics<parallel>, #tpu.dimension_semantics<parallel>, #tpu.dimension_semantics<arbitrary>], iteration_bounds = array<i64: 2, 1, 1, 1>, scalar_prefetch = 0 : i64, scratch_operands = 1 : i64, tpu.core_type = #tpu.core_type<tc>, window_params = [{transform_indices = @transform_0, window_bounds = array<i64: 1, 1, 108, 512>}, {transform_indices = @transform_1, window_bounds = array<i64: 1, 88, 108>}, {transform_indices = @transform_2, window_bounds = array<i64: 1, 88, 1>}, {transform_indices = @transform_3, window_bounds = array<i64: 1, 1, 88, 512>}]} {
    %c0_i32 = arith.constant 0 : i32
    %0 = arith.cmpi eq, %arg3, %c0_i32 : i32
    %1 = arith.extui %0 : i1 to i32
    %c0_i32_0 = arith.constant 0 : i32
    %2 = arith.cmpi ne, %1, %c0_i32_0 : i32
    scf.if %2 {
      %cst_13 = arith.constant 0.000000e+00 : f32
      %14 = vector.broadcast %cst_13 : f32 to vector<88x512xf32>
      %c0_14 = arith.constant 0 : index
      %c0_15 = arith.constant 0 : index
      %15 = vector.load %arg8[%c0_14, %c0_15] : memref<88x512xf32, #tpu.memory_space<vmem>>, vector<88x512xf32>
      tpu.vector_store %arg8[%c0_14, %c0_15], %14 {strides = array<i32>} : memref<88x512xf32, #tpu.memory_space<vmem>>, vector<88x512xf32>,
    } else {
    }
    %c0 = arith.constant 0 : index
    %c0_1 = arith.constant 0 : index
    %3 = vector.load %arg8[%c0, %c0_1] : memref<88x512xf32, #tpu.memory_space<vmem>>, vector<88x512xf32>
    %c0_2 = arith.constant 0 : index
    %c0_3 = arith.constant 0 : index
    %c0_4 = arith.constant 0 : index
    %4 = vector.load %arg5[%c0_2, %c0_3, %c0_4] : memref<1x88x108xf32, #tpu.memory_space<vmem>>, vector<1x88x108xf32>
    %5 = vector.shape_cast %4 : vector<1x88x108xf32> to vector<88x108xf32>
    %c0_5 = arith.constant 0 : index
    %c0_6 = arith.constant 0 : index
    %c0_7 = arith.constant 0 : index
    %c0_8 = arith.constant 0 : index
    %6 = vector.load %arg4[%c0_5, %c0_6, %c0_7, %c0_8] : memref<1x1x108x512xf32, #tpu.memory_space<vmem>>, vector<1x1x108x512xf32>
    %7 = vector.shape_cast %6 : vector<1x1x108x512xf32> to vector<108x512xf32>
    %cst = arith.constant dense<0.000000e+00> : vector<88x512xf32>
    %8 = tpu.matmul %5, %7, %cst {dimension_numbers = #tpu.dot_dimension_numbers<[1], [0], [0], [1], [0, 0, 1, 1], [], []>} : vector<88x108xf32>, vector<108x512xf32>, vector<88x512xf32> -> vector<88x512xf32>
    %9 = arith.addf %3, %8 : vector<88x512xf32>
    %c0_9 = arith.constant 0 : index
    %c0_10 = arith.constant 0 : index
    %10 = vector.load %arg8[%c0_9, %c0_10] : memref<88x512xf32, #tpu.memory_space<vmem>>, vector<88x512xf32>
    tpu.vector_store %arg8[%c0_9, %c0_10], %9 {strides = array<i32>} : memref<88x512xf32, #tpu.memory_space<vmem>>, vector<88x512xf32>,
    %c0_i32_11 = arith.constant 0 : i32
    %11 = arith.cmpi eq, %arg3, %c0_i32_11 : i32
    %12 = arith.extui %11 : i1 to i32
    %c0_i32_12 = arith.constant 0 : i32
    %13 = arith.cmpi ne, %12, %c0_i32_12 : i32
    scf.if %13 {
      %c0_13 = arith.constant 0 : index
      %c0_14 = arith.constant 0 : index
      %14 = vector.load %arg8[%c0_13, %c0_14] : memref<88x512xf32, #tpu.memory_space<vmem>>, vector<88x512xf32>
      %c0_15 = arith.constant 0 : index
      %c0_16 = arith.constant 0 : index
      %c0_17 = arith.constant 0 : index
      %15 = vector.load %arg6[%c0_15, %c0_16, %c0_17] : memref<1x88x1xf32, #tpu.memory_space<vmem>>, vector<1x88x1xf32>
      %16 = vector.shape_cast %15 : vector<1x88x1xf32> to vector<88x1xf32>
      %17 = vector.broadcast %16 : vector<88x1xf32> to vector<88x512xf32>
      %18 = arith.addf %14, %17 : vector<88x512xf32>
      %c0_18 = arith.constant 0 : index
      %c0_19 = arith.constant 0 : index
      %c0_20 = arith.constant 0 : index
      %c0_21 = arith.constant 0 : index
      %19 = vector.load %arg7[%c0_18, %c0_19, %c0_20, %c0_21] : memref<1x1x88x512xf32, #tpu.memory_space<vmem>>, vector<1x1x88x512xf32>
      %20 = vector.shape_cast %19 : vector<1x1x88x512xf32> to vector<88x512xf32>
      %21 = vector.shape_cast %18 : vector<88x512xf32> to vector<1x1x88x512xf32>
      tpu.vector_store %arg7[%c0_18, %c0_19, %c0_20, %c0_21], %21 {strides = array<i32>} : memref<1x1x88x512xf32, #tpu.memory_space<vmem>>, vector<1x1x88x512xf32>,
    } else {
    }
    return
  }
  func.func @transform_0(%arg0: i32, %arg1: i32, %arg2: i32, %arg3: i32) -> (i32, i32, i32, i32) {
    %c0_i32 = arith.constant 0 : i32
    return %arg0, %arg1, %arg3, %arg2 : i32, i32, i32, i32
  }
  func.func @transform_1(%arg0: i32, %arg1: i32, %arg2: i32, %arg3: i32) -> (i32, i32, i32) {
    %c0_i32 = arith.constant 0 : i32
    %c0_i32_0 = arith.constant 0 : i32
    return %arg1, %c0_i32, %arg3 : i32, i32, i32
  }
  func.func @transform_2(%arg0: i32, %arg1: i32, %arg2: i32, %arg3: i32) -> (i32, i32, i32) {
    %c0_i32 = arith.constant 0 : i32
    %c0_i32_0 = arith.constant 0 : i32
    %c0_i32_1 = arith.constant 0 : i32
    return %arg1, %c0_i32, %c0_i32_0 : i32, i32, i32
  }
  func.func @transform_3(%arg0: i32, %arg1: i32, %arg2: i32, %arg3: i32) -> (i32, i32, i32, i32) {
    %c0_i32 = arith.constant 0 : i32
    %c0_i32_0 = arith.constant 0 : i32
    return %arg0, %arg1, %c0_i32, %arg2 : i32, i32, i32, i32
  }
}

</mosaic_0001>

<bundles_post_ra>
// kernel: tpu_custom_call.1
= control target key start
LH: loop header
LB: loop body
LE: loop exit
PB: predicated region body
PF: predicated region fallthrough
CT: control target
= control target key end

     0   :  { %8 = vsyncpa [#allocation4], 0  ;;  %s1747_s0 = inlined_call_operand.vmem [shape: f32[2,1,108,512], index: 0, kind: input, shape index: {}]   ;;  %s1748_s1 = inlined_call_operand.vmem [shape: f32[1,88,108], index: 1, kind: input, shape index: {}]   ;;  %s1749_s2 = inlined_call_operand.vmem [shape: f32[1,88,1], index: 2, kind: input, shape index: {}]   ;;  %s1750_s3 = inlined_call_operand.hbm [shape: f32[2,1,88,512], index: 3, kind: output, shape index: {}]  }
   0x1   :  { %10 = vsyncpa [#allocation4 + $0x1], 0  ;;  %s1414_s12 = smov 0   ;;  %s1416_s13 = smov 0  }
   0x2   :  { %s1418_s14 = smov 0   ;;  %s1420_s15 = smov 0  }
   0x3   :  { %s1422_s16 = smov 0   ;;  %s1424_s17 = smov 0  }
   0x4 LB: > { %s1210_s18 = sadd.s32 4294967295, %s1387_s17   ;;  %s1211_s19 = sadd.s32 4294967294, %s1387_s17   ;;  %s1387_s17 = sphi %s1424_s17, %s16_s17   ;;  %s1383_s16 = sphi %s1422_s16, %s1757_s16   ;;  %s1379_s15 = sphi %s1420_s15, %s1756_s15   ;;  %s1375_s14 = sphi %s1418_s14, %s1755_s14   ;;  %s1371_s13 = sphi %s1416_s13, %s1754_s13   ;;  %s1367_s12 = sphi %s1414_s12, %s1753_s12  }
   0x5   : > { %s42_s20 = sadd.s32 1, %s1383_s16  ;;  %s139_s21 = sadd.s32 1, %s1375_s14 }
   0x6   : > { %p44_p0 = scmp.ge.s32.totalorder %s42_s20, 2  ;;  %p149_p1 = scmp.ne.s32.totalorder %s1375_s14, %s1371_s13 }
   0x7   : > { %p150_p2 = scmp.eq.s32.totalorder %s1210_s18, 1  ;;  %p155_p3 = scmp.ne.s32.totalorder %s1371_s13, %s1367_s12 }
   0x8   : > { %s1759_s20 = smov (%p44_p0, %s42_s20), 0  ;;  %p156_p5 = scmp.eq.s32.totalorder %s1211_s19, 1 }
   0x9   : > { %p1454_p4 = por %p150_p2, %p149_p1  ;;  %s132_s23 = ssub.s32 %s1383_s16, %s1759_s20 }
   0xa   : > { %p1216_p6 = scmp.ge.s32.totalorder %s1387_s17, 1  ;;  %p137_p7 = scmp.eq.s32.totalorder %s132_s23, 0 }
   0xb   : > { %p1461_p8 = por %p156_p5, %p155_p3  ;;  %p216_p9 = scmp.lt.s32.totalorder %s1387_s17, 3 }
   0xc   : > { %s1467_s25 = scalar_select %p137_p7, %s1375_s14, %s139_s21  }
   0xd   : > { %p217_p10 = pnand %p1216_p6, %p216_p9 }
   0xe   : > { %p268_p11 = scmp.lt.s32.totalorder (!%p217_p10), %s1379_s15, 1  ;;  %s263_s21 = sand.u32 (!%p217_p10), 1, %s1371_s13  }
   0xf   : > { %220 = sbr.rel (%p217_p10) target bundleno = 305 (0x131), region = 32  ;;  %s1702_s4 = scalar_lea.sflag (!%p217_p10), [#allocation4], %s263_s21 }
  0x10   : > { %s1247_s23 = smul.u32 (!%p217_p10), 352, %s263_s21  ;;  %s1391_s6 = smov (!%p217_p10), [#allocation3]  }
  0x14   : > { %v1389_v0 = vmov 0.0   ;;  %s269_s26 = scalar_select %p268_p11, %s1379_s15, 1  ;;  %v1390_v1 = vmov 0   ;;  %v903_v2 = vld [vmem:[%s1749_s2] sm:$0xff]  ;;  %v905_v3 = vld [vmem:[%s1749_s2 + $0x10] sm:$0xff]  ;;  %vm493_vm0 = vcmask 1043456  }
  0x15   : > { %570 = vmatprep.mubr.f32.mxu0 %v1389_v0  ;;  %701 = vmatprep.mubr.f32.mxu1 %v1389_v0  ;;  %v392_v60 = vld [vmem:[%s1748_s1] sm:$0xff]  ;;  %vm459_vm1 = vcmask 883712   ;;  %v904_v61 = vld [vmem:[%s1749_s2 + $0x8] sm:$0xff]  ;;  %v906_v62 = vld [vmem:[%s1749_s2 + $0x18] sm:$0xff] }
  0x16   : > { %1309 = vset.pattern.permute.xlu0 %v1390_v1  ;;  %1310 = vset.pattern.permute.xlu1 %v1390_v1  ;;  %s1248_s27 = smul.u32 448, %s269_s26  ;;  %v393_v63 = vld [vmem:[%s1748_s1 + $0x8] sm:$0xff]  ;;  %v907_v1 = vld [vmem:[%s1749_s2 + $0x20] sm:$0xff]  ;;  %s1645_s26 = scalar_lea.vmem [#allocation3], %s1247_s23 }
  0x17   : > { %916 = vperm.xlu0 %1309, %v903_v2   ;;  %926 = vperm.xlu1 %1310, %v905_v3   ;;  %v908_v2 = vld [vmem:[%s1749_s2 + $0x28] sm:$0xff]  ;;  %v394_v3 = vld [vmem:[%s1748_s1 + $0x10] sm:$0xff]  ;;  %s1075_s28 = sshll.u32 %s1645_s26, 4  ;;  %s1694_s28 = int_to_ptr.vmem [resolvable:$true] %s1075_s28 }
  0x18   : > { %s1482_s7 = scalar_lea.vmem %s1747_s0, %s1248_s27  ;;  %s1249_s27 = smul.u32 5632, %s1379_s15 }
  0x19   : > { %v456_v4 = vld [vmem:[%s1482_s7 + $0x1a8] sm:$0xf]  ;;  %v458_v5 = vld [vmem:[%s1482_s7 + $0x1b8] sm:$0xf]  ;;  %v455_v6 = vld [vmem:[%s1482_s7 + $0x1a0] sm:$0xf] }
  0x1a   : > { %1218 = vmatprep.subr.msk.mxu0 %vm493_vm0, %v456_v4  ;;  %1231 = vmatprep.subr.msk.mxu1 %vm493_vm0, %v458_v5  ;;  %v457_v7 = vld [vmem:[%s1482_s7 + $0x1b0] sm:$0xf]  ;;  %v452_v8 = vld [vmem:[%s1482_s7 + $0x188] sm:$0xff]  ;;  %v454_v9 = vld [vmem:[%s1482_s7 + $0x198] sm:$0xff]  ;;  %s1692_s30 = scalar_lea.hbm %s1750_s3, %s1249_s27  ;;  %s1311_s5 = scalar_lea.vmem %s1694_s28, 5632 }
  0x1b   : > { %1219 = vmatpush1.msk.msra.mxu0 %vm493_vm0, %v455_v6  ;;  %1232 = vmatpush1.msk.msra.mxu1 %vm493_vm0, %v457_v7  ;;  %v451_v10 = vld [vmem:[%s1482_s7 + $0x180] sm:$0xff]  ;;  %v453_v11 = vld [vmem:[%s1482_s7 + $0x190] sm:$0xff]  ;;  %v448_v12 = vld [vmem:[%s1482_s7 + $0x168] sm:$0xff]  ;;  %p1312_p12 = scmp.ne.s32.totalorder %s1694_s28, %s1311_s5 }
  0x1c   : > { %512 = vmatprep.subr.mxu0 %v452_v8  ;;  %643 = vmatprep.subr.mxu1 %v454_v9  ;;  %v450_v13 = vld [vmem:[%s1482_s7 + $0x178] sm:$0xff]  ;;  %v447_v14 = vld [vmem:[%s1482_s7 + $0x160] sm:$0xff]  ;;  %v449_v15 = vld [vmem:[%s1482_s7 + $0x170] sm:$0xff] }
  0x1d   : > { %513 = vmatpush1.msra.mxu0 %v451_v10  ;;  %644 = vmatpush1.msra.mxu1 %v453_v11  ;;  %v444_v16 = vld [vmem:[%s1482_s7 + $0x148] sm:$0xff]  ;;  %v446_v17 = vld [vmem:[%s1482_s7 + $0x158] sm:$0xff]  ;;  %v443_v18 = vld [vmem:[%s1482_s7 + $0x140] sm:$0xff]  ;;  %p1313_p13 = pnand %p1312_p12, %p1454_p4 }
  0x1e   : > { %514 = vmatprep.subr.mxu0 %v448_v12  ;;  %645 = vmatprep.subr.mxu1 %v450_v13  ;;  %v445_v19 = vld [vmem:[%s1482_s7 + $0x150] sm:$0xff]  ;;  %v440_v20 = vld [vmem:[%s1482_s7 + $0x128] sm:$0xff]  ;;  %v442_v21 = vld [vmem:[%s1482_s7 + $0x138] sm:$0xff] }
  0x1f   : > { %515 = vmatpush1.msra.mxu0 %v447_v14  ;;  %646 = vmatpush1.msra.mxu1 %v449_v15  ;;  %v439_v22 = vld [vmem:[%s1482_s7 + $0x120] sm:$0xff]  ;;  %v441_v23 = vld [vmem:[%s1482_s7 + $0x130] sm:$0xff]  ;;  %v436_v24 = vld [vmem:[%s1482_s7 + $0x108] sm:$0xff]  ;;  %p1314_p0 = pneg %p1313_p13 }
  0x20   : > { %516 = vmatprep.subr.mxu0 %v444_v16  ;;  %647 = vmatprep.subr.mxu1 %v446_v17  ;;  %v438_v25 = vld [vmem:[%s1482_s7 + $0x118] sm:$0xff]  ;;  %v435_v26 = vld [vmem:[%s1482_s7 + $0x100] sm:$0xff]  ;;  %v437_v27 = vld [vmem:[%s1482_s7 + $0x110] sm:$0xff] }
  0x21   : > { %517 = vmatpush1.msra.mxu0 %v443_v18  ;;  %648 = vmatpush1.msra.mxu1 %v445_v19  ;;  %v432_v28 = vld [vmem:[%s1482_s7 + $0xe8] sm:$0xff]  ;;  %v434_v29 = vld [vmem:[%s1482_s7 + $0xf8] sm:$0xff]  ;;  %v431_v30 = vld [vmem:[%s1482_s7 + $0xe0] sm:$0xff] }
  0x22   : > { %518 = vmatprep.subr.mxu0 %v440_v20  ;;  %649 = vmatprep.subr.mxu1 %v442_v21  ;;  %v433_v31 = vld [vmem:[%s1482_s7 + $0xf0] sm:$0xff]  ;;  %v428_v32 = vld [vmem:[%s1482_s7 + $0xc8] sm:$0xff]  ;;  %v430_v33 = vld [vmem:[%s1482_s7 + $0xd8] sm:$0xff] }
  0x23   : > { %519 = vmatpush1.msra.mxu0 %v439_v22  ;;  %650 = vmatpush1.msra.mxu1 %v441_v23  ;;  %v427_v34 = vld [vmem:[%s1482_s7 + $0xc0] sm:$0xff]  ;;  %v429_v35 = vld [vmem:[%s1482_s7 + $0xd0] sm:$0xff]  ;;  %v424_v36 = vld [vmem:[%s1482_s7 + $0xa8] sm:$0xff] }
  0x24   : > { %520 = vmatprep.subr.mxu0 %v436_v24  ;;  %651 = vmatprep.subr.mxu1 %v438_v25  ;;  %v426_v37 = vld [vmem:[%s1482_s7 + $0xb8] sm:$0xff]  ;;  %v423_v38 = vld [vmem:[%s1482_s7 + $0xa0] sm:$0xff]  ;;  %v425_v39 = vld [vmem:[%s1482_s7 + $0xb0] sm:$0xff] }
  0x25   : > { %521 = vmatpush1.msra.mxu0 %v435_v26  ;;  %652 = vmatpush1.msra.mxu1 %v437_v27  ;;  %v420_v40 = vld [vmem:[%s1482_s7 + $0x88] sm:$0xff]  ;;  %v422_v41 = vld [vmem:[%s1482_s7 + $0x98] sm:$0xff]  ;;  %v419_v42 = vld [vmem:[%s1482_s7 + $0x80] sm:$0xff] }
  0x26   : > { %522 = vmatprep.subr.mxu0 %v432_v28  ;;  %653 = vmatprep.subr.mxu1 %v434_v29  ;;  %v421_v43 = vld [vmem:[%s1482_s7 + $0x90] sm:$0xff]  ;;  %v416_v44 = vld [vmem:[%s1482_s7 + $0x68] sm:$0xff]  ;;  %v418_v45 = vld [vmem:[%s1482_s7 + $0x78] sm:$0xff] }
  0x27   : > { %523 = vmatpush1.msra.mxu0 %v431_v30  ;;  %654 = vmatpush1.msra.mxu1 %v433_v31  ;;  %v415_v46 = vld [vmem:[%s1482_s7 + $0x60] sm:$0xff]  ;;  %v417_v47 = vld [vmem:[%s1482_s7 + $0x70] sm:$0xff]  ;;  %v412_v48 = vld [vmem:[%s1482_s7 + $0x48] sm:$0xff] }
  0x28   : > { %524 = vmatprep.subr.mxu0 %v428_v32  ;;  %655 = vmatprep.subr.mxu1 %v430_v33  ;;  %v414_v49 = vld [vmem:[%s1482_s7 + $0x58] sm:$0xff]  ;;  %v411_v50 = vld [vmem:[%s1482_s7 + $0x40] sm:$0xff]  ;;  %v413_v51 = vld [vmem:[%s1482_s7 + $0x50] sm:$0xff] }
  0x29   : > { %525 = vmatpush1.msra.mxu0 %v427_v34  ;;  %656 = vmatpush1.msra.mxu1 %v429_v35  ;;  %v408_v52 = vld [vmem:[%s1482_s7 + $0x28] sm:$0xff]  ;;  %v410_v53 = vld [vmem:[%s1482_s7 + $0x38] sm:$0xff]  ;;  %v407_v54 = vld [vmem:[%s1482_s7 + $0x20] sm:$0xff] }
  0x2a   : > { %526 = vmatprep.subr.mxu0 %v424_v36  ;;  %657 = vmatprep.subr.mxu1 %v426_v37  ;;  %v409_v55 = vld [vmem:[%s1482_s7 + $0x30] sm:$0xff]  ;;  %v404_v56 = vld [vmem:[%s1482_s7 + $0x8] sm:$0xff]  ;;  %v406_v57 = vld [vmem:[%s1482_s7 + $0x18] sm:$0xff] }
  0x2b   : > { %527 = vmatpush1.msra.mxu0 %v423_v38  ;;  %658 = vmatpush1.msra.mxu1 %v425_v39  ;;  %v403_v58 = vld [vmem:[%s1482_s7] sm:$0xff]  ;;  %v405_v59 = vld [vmem:[%s1482_s7 + $0x10] sm:$0xff]  ;;  %v910_v5 = vld [vmem:[%s1749_s2 + $0x38] sm:$0xff]  ;;  %s1315_s7 = sshll.u32 %s1391_s6, 4  ;;  %s1316_s7 = int_to_ptr.vmem [resolvable:$false] %s1315_s7 }
  0x2c   : > { %528 = vmatprep.subr.mxu0 %v420_v40  ;;  %659 = vmatprep.subr.mxu1 %v422_v41  ;;  %v909_v4 = vld [vmem:[%s1749_s2 + $0x30] sm:$0xff]  ;;  %v395_v6 = vld [vmem:[%s1748_s1 + $0x18] sm:$0xff]  ;;  %v911_v7 = vld [vmem:[%s1749_s2 + $0x40] sm:$0xff]  ;;  %s1317_s8 = scalar_lea.vmem %s1316_s7, 11264  ;;  %p1318_p1 = scmp.lt.s32.totalorder %s1694_s28, %s1316_s7 }
  0x2d   : > { %529 = vmatpush1.msra.mxu0 %v419_v42  ;;  %660 = vmatpush1.msra.mxu1 %v421_v43  ;;  %v912_v8 = vld [vmem:[%s1749_s2 + $0x48] sm:$0xff]  ;;  %v396_v9 = vld [vmem:[%s1748_s1 + $0x20] sm:$0xff]  ;;  %v913_v10 = vld [vmem:[%s1749_s2 + $0x50] sm:$0xff]  ;;  %p1319_p2 = scmp.lt.s32.totalorder %s1317_s8, %s1311_s5 }
  0x2e   : > { %530 = vmatprep.subr.mxu0 %v416_v44  ;;  %661 = vmatprep.subr.mxu1 %v418_v45  ;;  %v397_v11 = vld [vmem:[%s1748_s1 + $0x28] sm:$0xff]  ;;  %v398_v12 = vld [vmem:[%s1748_s1 + $0x30] sm:$0xff]  ;;  %v399_v13 = vld [vmem:[%s1748_s1 + $0x38] sm:$0xff] }
  0x2f   : > { %531 = vmatpush1.msra.mxu0 %v415_v46  ;;  %662 = vmatpush1.msra.mxu1 %v417_v47  ;;  %v400_v14 = vld [vmem:[%s1748_s1 + $0x40] sm:$0xff]  ;;  %v401_v15 = vld [vmem:[%s1748_s1 + $0x48] sm:$0xff]  ;;  %v402_v16 = vld [vmem:[%s1748_s1 + $0x50] sm:$0xff]  ;;  %p1320_p3 = por %p1319_p2, %p1318_p1 }
  0x30   : > { %532 = vmatprep.subr.mxu0 %v412_v48  ;;  %663 = vmatprep.subr.mxu1 %v414_v49 }
  0x31   : > { %533 = vmatpush1.msra.mxu0 %v411_v50  ;;  %664 = vmatpush1.msra.mxu1 %v413_v51  ;;  %p1321_p5 = pnand %p1320_p3, %p1314_p0 }
  0x32   : > { %534 = vmatprep.subr.mxu0 %v408_v52  ;;  %665 = vmatprep.subr.mxu1 %v410_v53 }
  0x33   : > { %535 = vmatpush1.msra.mxu0 %v407_v54  ;;  %666 = vmatpush1.msra.mxu1 %v409_v55 }
  0x34   : > { %536 = vmatprep.subr.mxu0 %v404_v56  ;;  %667 = vmatprep.subr.mxu1 %v406_v57 }
  0x35   : > { %537 = vmatpush1.msra.mxu0 %v403_v58  ;;  %668 = vmatpush1.msra.mxu1 %v405_v59 }
  0x36   : > { %1220 = vmatmul.mubr.msk.f32.vlgmr.msra.gmra.mxu0 %vm459_vm1, %v392_v60  ;;  %1233 = vmatmul.mubr.msk.f32.vlgmr.msra.gmra.mxu1 %vm459_vm1, %v392_v60 }
  0x37   : > { %576 = vmatprep.mubr.f32.mxu0 %v1389_v0  ;;  %707 = vmatprep.mubr.f32.mxu1 %v1389_v0 }
  0x38   : > { %921 = vperm.xlu0 %1309, %v904_v61   ;;  %931 = vperm.xlu1 %1310, %v906_v62  }
  0x3a   : > { %1221 = vmatmul.mubr.msk.f32.gmra.mxu0 %vm459_vm1, %v393_v63  ;;  %1234 = vmatmul.mubr.msk.f32.gmra.mxu1 %vm459_vm1, %v393_v63 }
  0x3b   : > { %582 = vmatprep.mubr.f32.mxu0 %v1389_v0  ;;  %713 = vmatprep.mubr.f32.mxu1 %v1389_v0 }
  0x3c   : > { %936 = vperm.xlu0 %1309, %v907_v1   ;;  %941 = vperm.xlu1 %1310, %v908_v2  }
  0x3e   : > { %1222 = vmatmul.mubr.msk.f32.gmra.mxu0 %vm459_vm1, %v394_v3  ;;  %1235 = vmatmul.mubr.msk.f32.gmra.mxu1 %vm459_vm1, %v394_v3 }
  0x3f   : > { %588 = vmatprep.mubr.f32.mxu0 %v1389_v0  ;;  %719 = vmatprep.mubr.f32.mxu1 %v1389_v0 }
  0x40   : > { %946 = vperm.xlu0 %1309, %v909_v4   ;;  %951 = vperm.xlu1 %1310, %v910_v5  }
  0x42   : > { %1223 = vmatmul.mubr.msk.f32.gmra.mxu0 %vm459_vm1, %v395_v6  ;;  %1236 = vmatmul.mubr.msk.f32.gmra.mxu1 %vm459_vm1, %v395_v6 }
  0x43   : > { %594 = vmatprep.mubr.f32.mxu0 %v1389_v0  ;;  %725 = vmatprep.mubr.f32.mxu1 %v1389_v0 }
  0x44   : > { %956 = vperm.xlu0 %1309, %v911_v7   ;;  %961 = vperm.xlu1 %1310, %v912_v8  }
  0x46   : > { %1224 = vmatmul.mubr.msk.f32.gmra.mxu0 %vm459_vm1, %v396_v9  ;;  %1237 = vmatmul.mubr.msk.f32.gmra.mxu1 %vm459_vm1, %v396_v9 }
  0x47   : > { %600 = vmatprep.mubr.f32.mxu0 %v1389_v0  ;;  %731 = vmatprep.mubr.f32.mxu1 %v1389_v0 }
  0x48   : > { %966 = vperm.xlu0 %1309, %v913_v10  }
  0x4a   : > { %1225 = vmatmul.mubr.msk.f32.gmra.mxu0 %vm459_vm1, %v397_v11  ;;  %1238 = vmatmul.mubr.msk.f32.gmra.mxu1 %vm459_vm1, %v397_v11 }
  0x4b   : > { %606 = vmatprep.mubr.f32.mxu0 %v1389_v0  ;;  %737 = vmatprep.mubr.f32.mxu1 %v1389_v0 }
  0x4e   : > { %1226 = vmatmul.mubr.msk.f32.gmra.mxu0 %vm459_vm1, %v398_v12  ;;  %1239 = vmatmul.mubr.msk.f32.gmra.mxu1 %vm459_vm1, %v398_v12 }
  0x4f   : > { %612 = vmatprep.mubr.f32.mxu0 %v1389_v0  ;;  %743 = vmatprep.mubr.f32.mxu1 %v1389_v0 }
  0x52   : > { %1227 = vmatmul.mubr.msk.f32.gmra.mxu0 %vm459_vm1, %v399_v13  ;;  %1240 = vmatmul.mubr.msk.f32.gmra.mxu1 %vm459_vm1, %v399_v13 }
  0x53   : > { %618 = vmatprep.mubr.f32.mxu0 %v1389_v0  ;;  %749 = vmatprep.mubr.f32.mxu1 %v1389_v0 }
  0x56   : > { %1228 = vmatmul.mubr.msk.f32.gmra.mxu0 %vm459_vm1, %v400_v14  ;;  %1241 = vmatmul.mubr.msk.f32.gmra.mxu1 %vm459_vm1, %v400_v14 }
  0x57   : > { %624 = vmatprep.mubr.f32.mxu0 %v1389_v0  ;;  %755 = vmatprep.mubr.f32.mxu1 %v1389_v0 }
  0x5a   : > { %1229 = vmatmul.mubr.msk.f32.gmra.mxu0 %vm459_vm1, %v401_v15  ;;  %1242 = vmatmul.mubr.msk.f32.gmra.mxu1 %vm459_vm1, %v401_v15 }
  0x5b   : > { %630 = vmatprep.mubr.f32.mxu0 %v1389_v0  ;;  %761 = vmatprep.mubr.f32.mxu1 %v1389_v0 }
  0x5e   : > { %1230 = vmatmul.mubr.msk.f32.gmra.mxu0 %vm459_vm1, %v402_v16  ;;  %1243 = vmatmul.mubr.msk.f32.gmra.mxu1 %vm459_vm1, %v402_v16 }
  0x92   : > { %v917_v17 = vpop.permute.xlu0 %916  ;;  %v927_v26 = vpop.permute.xlu1 %926 }
  0xb3   : > { %v922_v22 = vpop.permute.xlu0 %921  ;;  %v932_v39 = vpop.permute.xlu1 %931 }
  0xb7   : > { %v937_v50 = vpop.permute.xlu0 %936  ;;  %v942_v59 = vpop.permute.xlu1 %941 }
  0xbb   : > { %v947_v5 = vpop.permute.xlu0 %946  ;;  %v952_v14 = vpop.permute.xlu1 %951 }
  0xf6   : > { %v572_v18 = vpop.f32.mrf.mxu0  ;;  %v703_v19 = vpop.f32.mrf.mxu1 }
  0xf7   : > { %v969_v20 = vadd.f32 %v917_v17, %v572_v18  ;;  %v971_v21 = vadd.f32 %v917_v17, %v703_v19 }
  0xf8   : > { %v574_v23 = vpop.f32.mrf.mxu0  ;;  %v705_v24 = vpop.f32.mrf.mxu1 }
  0xf9   : > { %1013 = vst [vmem:[%s1645_s26] sm:$0xff] %v969_v20  ;;  %1015 = vst [vmem:[%s1645_s26 + $0x10] sm:$0xff] %v971_v21  ;;  %v970_v0 = vadd.f32 %v917_v17, %v574_v23  ;;  %v972_v25 = vadd.f32 %v917_v17, %v705_v24  ;;  %v957_v23 = vpop.permute.xlu0 %956 }
  0xfa   : > { %v578_v27 = vpop.f32.mrf.mxu0  ;;  %v709_v28 = vpop.f32.mrf.mxu1 }
  0xfb   : > { %1014 = vst [vmem:[%s1645_s26 + $0x8] sm:$0xff] %v970_v0  ;;  %1016 = vst [vmem:[%s1645_s26 + $0x18] sm:$0xff] %v972_v25  ;;  %v973_v29 = vadd.f32 %v922_v22, %v578_v27  ;;  %v975_v30 = vadd.f32 %v922_v22, %v709_v28 }
  0xfc   : > { %v580_v31 = vpop.f32.mrf.mxu0  ;;  %v711_v32 = vpop.f32.mrf.mxu1 }
  0xfd   : > { %1017 = vst [vmem:[%s1645_s26 + $0x20] sm:$0xff] %v973_v29  ;;  %1019 = vst [vmem:[%s1645_s26 + $0x30] sm:$0xff] %v975_v30  ;;  %v974_v33 = vadd.f32 %v922_v22, %v580_v31  ;;  %v976_v34 = vadd.f32 %v922_v22, %v711_v32  ;;  %v962_v31 = vpop.permute.xlu1 %961 }
  0xfe   : > { %v584_v35 = vpop.f32.mrf.mxu0  ;;  %v715_v36 = vpop.f32.mrf.mxu1 }
  0xff   : > { %1018 = vst [vmem:[%s1645_s26 + $0x28] sm:$0xff] %v974_v33  ;;  %1020 = vst [vmem:[%s1645_s26 + $0x38] sm:$0xff] %v976_v34  ;;  %v977_v37 = vadd.f32 %v927_v26, %v584_v35  ;;  %v979_v38 = vadd.f32 %v927_v26, %v715_v36 }
 0x100   : > { %v586_v40 = vpop.f32.mrf.mxu0  ;;  %v717_v41 = vpop.f32.mrf.mxu1 }
 0x101   : > { %1021 = vst [vmem:[%s1645_s26 + $0x40] sm:$0xff] %v977_v37  ;;  %1023 = vst [vmem:[%s1645_s26 + $0x50] sm:$0xff] %v979_v38  ;;  %v978_v42 = vadd.f32 %v927_v26, %v586_v40  ;;  %v980_v43 = vadd.f32 %v927_v26, %v717_v41  ;;  %v967_v40 = vpop.permute.xlu0 %966 }
 0x102   : > { %v590_v44 = vpop.f32.mrf.mxu0  ;;  %v721_v45 = vpop.f32.mrf.mxu1 }
 0x103   : > { %1022 = vst [vmem:[%s1645_s26 + $0x48] sm:$0xff] %v978_v42  ;;  %1024 = vst [vmem:[%s1645_s26 + $0x58] sm:$0xff] %v980_v43  ;;  %v981_v46 = vadd.f32 %v932_v39, %v590_v44  ;;  %v983_v47 = vadd.f32 %v932_v39, %v721_v45 }
 0x104   : > { %v592_v48 = vpop.f32.mrf.mxu0  ;;  %v723_v49 = vpop.f32.mrf.mxu1 }
 0x105   : > { %1025 = vst [vmem:[%s1645_s26 + $0x60] sm:$0xff] %v981_v46  ;;  %1027 = vst [vmem:[%s1645_s26 + $0x70] sm:$0xff] %v983_v47  ;;  %v982_v51 = vadd.f32 %v932_v39, %v592_v48  ;;  %v984_v52 = vadd.f32 %v932_v39, %v723_v49 }
 0x106   : > { %v596_v53 = vpop.f32.mrf.mxu0  ;;  %v727_v54 = vpop.f32.mrf.mxu1 }
 0x107   : > { %1026 = vst [vmem:[%s1645_s26 + $0x68] sm:$0xff] %v982_v51  ;;  %1028 = vst [vmem:[%s1645_s26 + $0x78] sm:$0xff] %v984_v52  ;;  %v985_v55 = vadd.f32 %v937_v50, %v596_v53  ;;  %v987_v56 = vadd.f32 %v937_v50, %v727_v54 }
 0x108   : > { %v598_v57 = vpop.f32.mrf.mxu0  ;;  %v729_v58 = vpop.f32.mrf.mxu1 }
 0x109   : > { %1029 = vst [vmem:[%s1645_s26 + $0x80] sm:$0xff] %v985_v55  ;;  %1031 = vst [vmem:[%s1645_s26 + $0x90] sm:$0xff] %v987_v56  ;;  %v986_v60 = vadd.f32 %v937_v50, %v598_v57  ;;  %v988_v61 = vadd.f32 %v937_v50, %v729_v58 }
 0x10a   : > { %v602_v62 = vpop.f32.mrf.mxu0  ;;  %v733_v63 = vpop.f32.mrf.mxu1 }
 0x10b   : > { %1030 = vst [vmem:[%s1645_s26 + $0x88] sm:$0xff] %v986_v60  ;;  %1032 = vst [vmem:[%s1645_s26 + $0x98] sm:$0xff] %v988_v61  ;;  %v989_v1 = vadd.f32 %v942_v59, %v602_v62  ;;  %v991_v2 = vadd.f32 %v942_v59, %v733_v63 }
 0x10c   : > { %v604_v3 = vpop.f32.mrf.mxu0  ;;  %v735_v4 = vpop.f32.mrf.mxu1 }
 0x10d   : > { %1033 = vst [vmem:[%s1645_s26 + $0xa0] sm:$0xff] %v989_v1  ;;  %1035 = vst [vmem:[%s1645_s26 + $0xb0] sm:$0xff] %v991_v2  ;;  %v990_v6 = vadd.f32 %v942_v59, %v604_v3  ;;  %v992_v7 = vadd.f32 %v942_v59, %v735_v4 }
 0x10e   : > { %v608_v8 = vpop.f32.mrf.mxu0  ;;  %v739_v9 = vpop.f32.mrf.mxu1 }
 0x10f   : > { %1034 = vst [vmem:[%s1645_s26 + $0xa8] sm:$0xff] %v990_v6  ;;  %1036 = vst [vmem:[%s1645_s26 + $0xb8] sm:$0xff] %v992_v7  ;;  %v993_v10 = vadd.f32 %v947_v5, %v608_v8  ;;  %v995_v11 = vadd.f32 %v947_v5, %v739_v9 }
 0x110   : > { %v610_v12 = vpop.f32.mrf.mxu0  ;;  %v741_v13 = vpop.f32.mrf.mxu1 }
 0x111   : > { %1037 = vst [vmem:[%s1645_s26 + $0xc0] sm:$0xff] %v993_v10  ;;  %1039 = vst [vmem:[%s1645_s26 + $0xd0] sm:$0xff] %v995_v11  ;;  %v994_v15 = vadd.f32 %v947_v5, %v610_v12  ;;  %v996_v16 = vadd.f32 %v947_v5, %v741_v13 }
 0x112   : > { %v614_v17 = vpop.f32.mrf.mxu0  ;;  %v745_v18 = vpop.f32.mrf.mxu1 }
 0x113   : > { %1038 = vst [vmem:[%s1645_s26 + $0xc8] sm:$0xff] %v994_v15  ;;  %1040 = vst [vmem:[%s1645_s26 + $0xd8] sm:$0xff] %v996_v16  ;;  %v997_v19 = vadd.f32 %v952_v14, %v614_v17  ;;  %v999_v20 = vadd.f32 %v952_v14, %v745_v18 }
 0x114   : > { %v616_v21 = vpop.f32.mrf.mxu0  ;;  %v747_v22 = vpop.f32.mrf.mxu1 }
 0x115   : > { %1041 = vst [vmem:[%s1645_s26 + $0xe0] sm:$0xff] %v997_v19  ;;  %1043 = vst [vmem:[%s1645_s26 + $0xf0] sm:$0xff] %v999_v20  ;;  %v998_v24 = vadd.f32 %v952_v14, %v616_v21  ;;  %v1000_v0 = vadd.f32 %v952_v14, %v747_v22 }
 0x116   : > { %v620_v25 = vpop.f32.mrf.mxu0  ;;  %v751_v26 = vpop.f32.mrf.mxu1 }
 0x117   : > { %1042 = vst [vmem:[%s1645_s26 + $0xe8] sm:$0xff] %v998_v24  ;;  %1044 = vst [vmem:[%s1645_s26 + $0xf8] sm:$0xff] %v1000_v0  ;;  %v1001_v27 = vadd.f32 %v957_v23, %v620_v25  ;;  %v1003_v28 = vadd.f32 %v957_v23, %v751_v26 }
 0x118   : > { %v622_v29 = vpop.f32.mrf.mxu0  ;;  %v753_v30 = vpop.f32.mrf.mxu1 }
 0x119   : > { %1045 = vst [vmem:[%s1645_s26 + $0x100] sm:$0xff] %v1001_v27  ;;  %1047 = vst [vmem:[%s1645_s26 + $0x110] sm:$0xff] %v1003_v28  ;;  %v1002_v32 = vadd.f32 %v957_v23, %v622_v29  ;;  %v1004_v33 = vadd.f32 %v957_v23, %v753_v30 }
 0x11a   : > { %v626_v34 = vpop.f32.mrf.mxu0  ;;  %v757_v35 = vpop.f32.mrf.mxu1 }
 0x11b   : > { %1046 = vst [vmem:[%s1645_s26 + $0x108] sm:$0xff] %v1002_v32  ;;  %1048 = vst [vmem:[%s1645_s26 + $0x118] sm:$0xff] %v1004_v33  ;;  %v1005_v36 = vadd.f32 %v962_v31, %v626_v34  ;;  %v1007_v37 = vadd.f32 %v962_v31, %v757_v35 }
 0x11c   : > { %v628_v38 = vpop.f32.mrf.mxu0  ;;  %v759_v39 = vpop.f32.mrf.mxu1 }
 0x11d   : > { %1049 = vst [vmem:[%s1645_s26 + $0x120] sm:$0xff] %v1005_v36  ;;  %1051 = vst [vmem:[%s1645_s26 + $0x130] sm:$0xff] %v1007_v37  ;;  %v1006_v41 = vadd.f32 %v962_v31, %v628_v38  ;;  %v1008_v42 = vadd.f32 %v962_v31, %v759_v39 }
 0x11e   : > { %v632_v43 = vpop.f32.mrf.mxu0  ;;  %v763_v44 = vpop.f32.mrf.mxu1 }
 0x11f   : > { %1050 = vst [vmem:[%s1645_s26 + $0x128] sm:$0xff] %v1006_v41  ;;  %1052 = vst [vmem:[%s1645_s26 + $0x138] sm:$0xff] %v1008_v42  ;;  %v1009_v45 = vadd.f32 %v967_v40, %v632_v43  ;;  %v1011_v46 = vadd.f32 %v967_v40, %v763_v44 }
 0x120   : > { %v634_v47 = vpop.f32.mrf.mxu0  ;;  %v765_v48 = vpop.f32.mrf.mxu1 }
 0x121   : > { %1053 = vst [vmem:[%s1645_s26 + $0x140] sm:$0xff] %v1009_v45  ;;  %1055 = vst [vmem:[%s1645_s26 + $0x150] sm:$0xff] %v1011_v46  ;;  %v1010_v49 = vadd.f32 %v967_v40, %v634_v47  ;;  %v1012_v50 = vadd.f32 %v967_v40, %v765_v48 }
 0x123   : > { %1054 = vst [vmem:[%s1645_s26 + $0x148] sm:$0xff] %v1010_v49  ;;  %1056 = vst [vmem:[%s1645_s26 + $0x158] sm:$0xff] %v1012_v50 }
 0x124   : > { %1324 = shalt.err (!%p1321_p5)
}
 0x125   : > { %s1325_s9 = scalar_lea.hbm %s1692_s30, 5632  ;;  %s1329_s18 = scalar_lea.hbm %s1750_s3, 11264 }
 0x126   : > { %p1326_p6 = scmp.ne.s32.totalorder %s1692_s30, %s1325_s9  ;;  %p1330_p10 = scmp.lt.s32.totalorder %s1692_s30, %s1750_s3 }
 0x127   : > { %p1331_p11 = scmp.lt.s32.totalorder %s1329_s18, %s1325_s9 }
 0x128   : > { %p1327_p7 = pnand %p1326_p6, %p1454_p4 }
 0x129   : > { %p1332_p12 = por %p1331_p11, %p1330_p10 }
 0x12a   : > { %p1328_p9 = pneg %p1327_p7 }
 0x12c   : > { %p1333_p13 = pnand %p1332_p12, %p1328_p9 }
 0x12e   : > { %1336 = shalt.err (!%p1333_p13)
}
 0x12f   : > { %s1392_s23 = smov 512   ;;  %s1393_s26 = smov 32  }
 0x130   : > { %1250 = dma.vmem_to_hbm [thread:$0]  (%p1454_p4), %s1694_s28, 5632, %s1692_s30, %s1702_s4, %s1392_s23, %s1392_s23, %s1393_s26  }
 0x131 PF: > { %p1256_p0 = scmp.ge.s32.totalorder %s1387_s17, 2  ;;  %s1090_s27 = sand.u32 1, %s1367_s12  }
 0x132   : > { %s1091_s15 = scalar_lea.sflag [#allocation4], %s1090_s27 }
 0x133   : > { %p1253_p1 = pnand %p1256_p0, %p1461_p8 }
 0x135   : > { %p1254_p2 = pneg %p1253_p1 }
 0x137   : > { %1362 = dma.done.wait (%p1254_p2), %s1091_s15, 5632  }
 0x138   : > { %1364 = vsyncadd (%p1254_p2), %s1091_s15, 4294961664  ;;  %s16_s17 = sadd.s32 1, %s1387_s17   ;;  %s1753_s12 = smov %s1371_s13 }
 0x139   : > { %p13_p3 = scmp.ge.s32.totalorder %s16_s17, 4   ;;  %s1754_s13 = smov %s1375_s14 }
 0x13a   : > { %s1755_s14 = smov %s1467_s25  ;;  %s1756_s15 = smov %s1383_s16 }
 0x13b   : > { %s1757_s16 = smov %s1759_s20  ;;  %15 = sbr.rel (!%p13_p3) target bundleno = 4 (0x4), region = 81 }
 0x140   :  { %1096 = vsyncpa [#allocation4], 1 }
 0x141   :  { %1098 = vsyncpa [#allocation4 + $0x1], 1 }

</bundles_post_ra>
